<compile_context>
chip_gen: v6e
topology: v6e:2x2x1
jax: 0.10.0
libtpu: 0.0.40
codegen_flags: <defaults>
</compile_context>

<pallas_src>
import math

import jax
import jax.numpy as jnp
from jax import lax
from jax.experimental import pallas as pl
from jax.experimental.pallas import tpu as pltpu

TM = 256                       # row tile: multiple of 128; fills MXU M dim on v6e/v7x
LANE = 128                     # pad channel / K dims to this for lane-dense layout
VMEM_LIMIT = 48 * 1024 * 1024  # explicit scoped-VMEM budget (safe on v5e/v6e/v7x)


def _round_up(x, m):
    return (x + m - 1) // m * m


def _pad2(x, rows, cols):
    r, c = x.shape
    return jnp.pad(x, ((0, rows - r), (0, cols - c)))


def _compiler_params():
    return pltpu.CompilerParams(
        dimension_semantics=("parallel",),
        vmem_limit_bytes=VMEM_LIMIT,
    )


# ----------------------------- Pallas kernels ------------------------------

def _mm_bn_relu_kernel(p_ref, w_ref, scale_ref, bias_ref, o_ref):
    # bf16 operands -> MXU, f32 accumulate; BN2 affine + ReLU epilogue in f32.
    acc = jnp.dot(p_ref[...], w_ref[...], preferred_element_type=jnp.float32)
    o_ref[...] = jnp.maximum(acc * scale_ref[...] + bias_ref[...], 0.0)


def _mm_add_kernel(p_ref, w_ref, res_ref, o_ref):
    acc = jnp.dot(p_ref[...], w_ref[...], preferred_element_type=jnp.float32)
    o_ref[...] = acc + res_ref[...]


def _mm_kernel(p_ref, w_ref, o_ref):
    o_ref[...] = jnp.dot(p_ref[...], w_ref[...], preferred_element_type=jnp.float32)


# ----------------------------- kernel wrappers ------------------------------

def matmul_bn_relu(p, w, scale, bias):
    """relu((p @ w) * scale + bias) with bf16 MXU operands and padded tiles."""
    M, K = p.shape
    Co = w.shape[1]
    Mp, Kp, Cop = _round_up(M, TM), _round_up(K, LANE), _round_up(Co, LANE)
    p_b = _pad2(p, Mp, Kp).astype(jnp.bfloat16)
    w_b = _pad2(w, Kp, Cop).astype(jnp.bfloat16)
    s_p = _pad2(scale, 1, Cop)
    b_p = _pad2(bias, 1, Cop)
    out = pl.pallas_call(
        _mm_bn_relu_kernel,
        out_shape=jax.ShapeDtypeStruct((Mp, Cop), jnp.float32),
        grid=(Mp // TM,),
        in_specs=[pl.BlockSpec((TM, Kp), lambda i: (i, 0)),
                  pl.BlockSpec((Kp, Cop), lambda i: (0, 0)),
                  pl.BlockSpec((1, Cop), lambda i: (0, 0)),
                  pl.BlockSpec((1, Cop), lambda i: (0, 0))],
        out_specs=pl.BlockSpec((TM, Cop), lambda i: (i, 0)),
        compiler_params=_compiler_params(),
    )(p_b, w_b, s_p, b_p)
    return out[:M, :Co]


def matmul_add(p, w, res):
    """(p @ w) + res (identity residual), bf16 MXU operands, f32 residual add."""
    M, K = p.shape
    Co = w.shape[1]
    Mp, Kp, Cop = _round_up(M, TM), _round_up(K, LANE), _round_up(Co, LANE)
    p_b = _pad2(p, Mp, Kp).astype(jnp.bfloat16)
    w_b = _pad2(w, Kp, Cop).astype(jnp.bfloat16)
    r_p = _pad2(res, Mp, Cop)  # keep residual in f32 for accuracy
    out = pl.pallas_call(
        _mm_add_kernel,
        out_shape=jax.ShapeDtypeStruct((Mp, Cop), jnp.float32),
        grid=(Mp // TM,),
        in_specs=[pl.BlockSpec((TM, Kp), lambda i: (i, 0)),
                  pl.BlockSpec((Kp, Cop), lambda i: (0, 0)),
                  pl.BlockSpec((TM, Cop), lambda i: (i, 0))],
        out_specs=pl.BlockSpec((TM, Cop), lambda i: (i, 0)),
        compiler_params=_compiler_params(),
    )(p_b, w_b, r_p)
    return out[:M, :Co]


def matmul_fused_shortcut(p, w, a_sub, wsc):
    """conv2 + 1x1 shortcut as ONE contraction: [p | a_sub] @ [[w],[wsc]]."""
    M, K = p.shape
    Co = w.shape[1]
    Ci = a_sub.shape[1]
    Mp = _round_up(M, TM)
    Kp, Cip, Cop = _round_up(K, LANE), _round_up(Ci, LANE), _round_up(Co, LANE)
    Kt = Kp + Cip
    p_cat = jnp.concatenate(
        [_pad2(p, Mp, Kp), _pad2(a_sub, Mp, Cip)], axis=1).astype(jnp.bfloat16)
    w_cat = jnp.concatenate(
        [_pad2(w, Kp, Cop), _pad2(wsc, Cip, Cop)], axis=0).astype(jnp.bfloat16)
    out = pl.pallas_call(
        _mm_kernel,
        out_shape=jax.ShapeDtypeStruct((Mp, Cop), jnp.float32),
        grid=(Mp // TM,),
        in_specs=[pl.BlockSpec((TM, Kt), lambda i: (i, 0)),
                  pl.BlockSpec((Kt, Cop), lambda i: (0, 0))],
        out_specs=pl.BlockSpec((TM, Cop), lambda i: (i, 0)),
        compiler_params=_compiler_params(),
    )(p_cat, w_cat)
    return out[:M, :Co]


# ------------------------------ glue (im2col) -------------------------------

def im2col(x, ksize, stride, pad):
    """x: (N,H,W,C) -> patches (N*Ho*Wo, ksize*ksize*C), plus (Ho, Wo)."""
    N, H, W, C = x.shape
    xp = jnp.pad(x, ((0, 0), (pad, pad), (pad, pad), (0, 0)))
    Ho = (H + 2 * pad - ksize) // stride + 1
    Wo = (W + 2 * pad - ksize) // stride + 1
    cols = []
    for kh in range(ksize):
        for kw in range(ksize):
            patch = xp[:, kh:kh + stride * Ho:stride, kw:kw + stride * Wo:stride, :]
            cols.append(patch)
    patches = jnp.concatenate(cols, axis=-1)  # K-order = (kh, kw, ci), matches HWIO reshape
    return patches.reshape(N * Ho * Wo, ksize * ksize * C), (Ho, Wo)


# ---------------------------- BasicBlock forward -----------------------------

def init_params(key, indim, outdim, stride, eps=1e-5):
    ks = jax.random.split(key, 12)

    def bn_fold(kg, kb, km, kv, c):
        gamma = jax.random.uniform(kg, (c,), jnp.float32, 0.5, 1.5)
        beta = 0.1 * jax.random.normal(kb, (c,), jnp.float32)
        mean = 0.1 * jax.random.normal(km, (c,), jnp.float32)
        var = jax.random.uniform(kv, (c,), jnp.float32, 0.5, 1.5)
        scale = gamma / jnp.sqrt(var + eps)
        bias = beta - mean * scale
        return scale.reshape(1, c), bias.reshape(1, c)

    bn1_scale, bn1_bias = bn_fold(ks[0], ks[1], ks[2], ks[3], indim)
    bn2_scale, bn2_bias = bn_fold(ks[4], ks[5], ks[6], ks[7], outdim)
    # conv weights in HWIO layout (kh, kw, ci, co)
    w1 = jax.random.normal(ks[8], (3, 3, indim, outdim), jnp.float32) / math.sqrt(9 * indim)
    w2 = jax.random.normal(ks[9], (3, 3, outdim, outdim), jnp.float32) / math.sqrt(9 * outdim)
    params = dict(
        stride=stride,
        bn1_scale=bn1_scale, bn1_bias=bn1_bias,
        bn2_scale=bn2_scale, bn2_bias=bn2_bias,
        w1=w1, w1_mat=w1.reshape(9 * indim, outdim),
        w2=w2, w2_mat=w2.reshape(9 * outdim, outdim),
    )
    if indim != outdim:
        wsc = jax.random.normal(ks[10], (1, 1, indim, outdim), jnp.float32) / math.sqrt(indim)
        params["wsc"] = wsc
        params["wsc_mat"] = wsc.reshape(indim, outdim)
    return params


def basic_block_forward(x_nchw, params):
    stride = params["stride"]
    x = jnp.transpose(x_nchw, (0, 2, 3, 1)).astype(jnp.float32)  # NCHW -> NHWC
    N, H, W, Cin = x.shape
    Cout = params["w1_mat"].shape[1]
    equaldim = (Cin == Cout)

    # BN1 + ReLU: plain JAX elementwise — at Cin << 128 a dedicated Pallas pass
    # uses a few lanes and pure grid-step overhead; XLA fuses this with the
    # surrounding transpose/pad instead (per performance review).
    a = jnp.maximum(x * params["bn1_scale"] + params["bn1_bias"], 0.0)

    # conv1 -> BN2 affine -> ReLU   [im2col glue + fused Pallas MXU matmul]
    p1, (Ho, Wo) = im2col(a, 3, stride, 1)
    b2d = matmul_bn_relu(p1, params["w1_mat"], params["bn2_scale"], params["bn2_bias"])
    b = b2d.reshape(N, Ho, Wo, Cout)

    # F.dropout with p=0.0 -> identity

    # conv2 (+ shortcut / residual)   [fused Pallas MXU matmul]
    p2, _ = im2col(b, 3, 1, 1)
    if equaldim:
        # Same implicit requirement as the PyTorch module: identity residual
        # only shape-checks when stride == 1 (torch.add would also fail).
        assert stride == 1
        res = x.reshape(N * H * W, Cin)
        out2d = matmul_add(p2, params["w2_mat"], res)
    else:
        a_sub = a[:, ::stride, ::stride, :].reshape(N * Ho * Wo, Cin)
        out2d = matmul_fused_shortcut(p2, params["w2_mat"], a_sub, params["wsc_mat"])

    out = out2d.reshape(N, Ho, Wo, Cout)
    return jnp.transpose(out, (0, 3, 1, 2))  # back to NCHW


# ------------------------------ pure-JAX reference ---------------------------

def reference_forward(x_nchw, params):
    stride = params["stride"]
    x = jnp.transpose(x_nchw, (0, 2, 3, 1)).astype(jnp.float32)
    Cin = x.shape[-1]
    Cout = params["w1"].shape[-1]
    dn = ("NHWC", "HWIO", "NHWC")
    a = jnp.maximum(x * params["bn1_scale"] + params["bn1_bias"], 0.0)
    c1 = lax.conv_general_dilated(a, params["w1"], (stride, stride),
                                  [(1, 1), (1, 1)], dimension_numbers=dn)
    b = jnp.maximum(c1 * params["bn2_scale"] + params["bn2_bias"], 0.0)
    c2 = lax.conv_general_dilated(b, params["w2"], (1, 1),
                                  [(1, 1), (1, 1)], dimension_numbers=dn)
    if Cin == Cout:
        res = x
    else:
        res = lax.conv_general_dilated(a, params["wsc"], (stride, stride),
                                       [(0, 0), (0, 0)], dimension_numbers=dn)
    return jnp.transpose(res + c2, (0, 3, 1, 2))


# ----------------------------------- main ------------------------------------

if __name__ == "__main__":
    key = jax.random.PRNGKey(0)
    kx, kp1, kp2 = jax.random.split(key, 3)
    x = jax.random.normal(kx, (2, 4, 16, 16), jnp.float32)  # NCHW, like PyTorch

    # bf16 MXU operands (f32 accumulate) -> compare against f32 reference with
    # a tolerance consistent with bf16 input rounding.
    TOL = 5e-2

    # case 1: indim != outdim (fused 1x1-conv shortcut path), stride 2
    params_a = init_params(kp1, indim=4, outdim=8, stride=2)
    out_a = jax.block_until_ready(basic_block_forward(x, params_a))
    ref_a = jax.block_until_ready(reference_forward(x, params_a))
    assert out_a.shape == (2, 8, 8, 8)
    assert jnp.allclose(out_a, ref_a, atol=TOL, rtol=TOL), \
        float(jnp.max(jnp.abs(out_a - ref_a)))

    # case 2: indim == outdim (identity residual path), stride 1
    params_b = init_params(kp2, indim=4, outdim=4, stride=1)
    out_b = jax.block_until_ready(basic_block_forward(x, params_b))
    ref_b = jax.block_until_ready(reference_forward(x, params_b))
    assert out_b.shape == (2, 4, 16, 16)
    assert jnp.allclose(out_b, ref_b, atol=TOL, rtol=TOL), \
        float(jnp.max(jnp.abs(out_b - ref_b)))

    print("KERNEL_OK")
</pallas_src>

<mosaic_0001>
module attributes {stable_mosaic.version = 11 : i64} {
  func.func @_mm_bn_relu_kernel(%arg0: i32, %arg1: memref<256x128xbf16, #tpu.memory_space<vmem>>, %arg2: memref<128x128xbf16, #tpu.memory_space<vmem>>, %arg3: memref<1x128xf32, #tpu.memory_space<vmem>>, %arg4: memref<1x128xf32, #tpu.memory_space<vmem>>, %arg5: memref<256x128xf32, #tpu.memory_space<vmem>>) attributes {dimension_semantics = [#tpu.dimension_semantics<parallel>], iteration_bounds = array<i64: 1>, scalar_prefetch = 0 : i64, scratch_operands = 0 : i64, tpu.core_type = #tpu.core_type<tc>, window_params = [{transform_indices = @transform_0, window_bounds = array<i64: 256, 128>}, {pipeline_mode = #tpu.pipeline_mode<synchronous>, transform_indices = @transform_1, window_bounds = array<i64: 128, 128>}, {pipeline_mode = #tpu.pipeline_mode<synchronous>, transform_indices = @transform_2, window_bounds = array<i64: 1, 128>}, {pipeline_mode = #tpu.pipeline_mode<synchronous>, transform_indices = @transform_3, window_bounds = array<i64: 1, 128>}, {transform_indices = @transform_4, window_bounds = array<i64: 256, 128>}]} {
    %c0 = arith.constant 0 : index
    %c0_0 = arith.constant 0 : index
    %0 = vector.load %arg1[%c0, %c0_0] : memref<256x128xbf16, #tpu.memory_space<vmem>>, vector<256x128xbf16>
    %c0_1 = arith.constant 0 : index
    %c0_2 = arith.constant 0 : index
    %1 = vector.load %arg2[%c0_1, %c0_2] : memref<128x128xbf16, #tpu.memory_space<vmem>>, vector<128x128xbf16>
    %cst = arith.constant dense<0.000000e+00> : vector<256x128xf32>
    %2 = tpu.matmul %0, %1, %cst {dimension_numbers = #tpu.dot_dimension_numbers<[1], [0], [0], [1], [0, 0, 1, 1], [], []>} : vector<256x128xbf16>, vector<128x128xbf16>, vector<256x128xf32> -> vector<256x128xf32>
    %c0_3 = arith.constant 0 : index
    %c0_4 = arith.constant 0 : index
    %3 = vector.load %arg3[%c0_3, %c0_4] : memref<1x128xf32, #tpu.memory_space<vmem>>, vector<1x128xf32>
    %4 = vector.broadcast %3 : vector<1x128xf32> to vector<256x128xf32>
    %5 = arith.mulf %2, %4 : vector<256x128xf32>
    %c0_5 = arith.constant 0 : index
    %c0_6 = arith.constant 0 : index
    %6 = vector.load %arg4[%c0_5, %c0_6] : memref<1x128xf32, #tpu.memory_space<vmem>>, vector<1x128xf32>
    %7 = vector.broadcast %6 : vector<1x128xf32> to vector<256x128xf32>
    %8 = arith.addf %5, %7 : vector<256x128xf32>
    %cst_7 = arith.constant 0.000000e+00 : f32
    %9 = vector.broadcast %cst_7 : f32 to vector<256x128xf32>
    %10 = arith.maximumf %8, %9 : vector<256x128xf32>
    %c0_8 = arith.constant 0 : index
    %c0_9 = arith.constant 0 : index
    %11 = vector.load %arg5[%c0_8, %c0_9] : memref<256x128xf32, #tpu.memory_space<vmem>>, vector<256x128xf32>
    tpu.vector_store %arg5[%c0_8, %c0_9], %10 {strides = array<i32>} : memref<256x128xf32, #tpu.memory_space<vmem>>, vector<256x128xf32>,
    return
  }
  func.func @transform_0(%arg0: i32) -> (i32, i32) {
    %c0_i32 = arith.constant 0 : i32
    %c0_i32_0 = arith.constant 0 : i32
    return %arg0, %c0_i32 : i32, i32
  }
  func.func @transform_1(%arg0: i32) -> (i32, i32) {
    %c0_i32 = arith.constant 0 : i32
    %c0_i32_0 = arith.constant 0 : i32
    %c0_i32_1 = arith.constant 0 : i32
    return %c0_i32, %c0_i32_0 : i32, i32
  }
  func.func @transform_2(%arg0: i32) -> (i32, i32) {
    %c0_i32 = arith.constant 0 : i32
    %c0_i32_0 = arith.constant 0 : i32
    %c0_i32_1 = arith.constant 0 : i32
    return %c0_i32, %c0_i32_0 : i32, i32
  }
  func.func @transform_3(%arg0: i32) -> (i32, i32) {
    %c0_i32 = arith.constant 0 : i32
    %c0_i32_0 = arith.constant 0 : i32
    %c0_i32_1 = arith.constant 0 : i32
    return %c0_i32, %c0_i32_0 : i32, i32
  }
  func.func @transform_4(%arg0: i32) -> (i32, i32) {
    %c0_i32 = arith.constant 0 : i32
    %c0_i32_0 = arith.constant 0 : i32
    return %arg0, %c0_i32 : i32, i32
  }
}

</mosaic_0001>

<bundles_post_ra>
// kernel: tpu_custom_call.1
= control target key start
LH: loop header
LB: loop body
LE: loop exit
PB: predicated region body
PF: predicated region fallthrough
CT: control target
= control target key end

     0   :  { %9 = vsyncpa [#allocation3], 0  ;;  %s886_s0 = inlined_call_operand.hbm [shape: bf16[256,128], index: 0, kind: input, shape index: {}]   ;;  %s887_s1 = inlined_call_operand.hbm [shape: bf16[128,128], index: 1, kind: input, shape index: {}]   ;;  %s888_s2 = inlined_call_operand.vmem [shape: f32[1,128], index: 2, kind: input, shape index: {}]   ;;  %s889_s3 = inlined_call_operand.vmem [shape: f32[1,128], index: 3, kind: input, shape index: {}]   ;;  %s890_s4 = inlined_call_operand.hbm [shape: f32[256,128], index: 4, kind: output, shape index: {}]  }
   0x1   :  { %10 = vsyncpa [#allocation6], 0 }
   0x2   :  { %11 = vsyncpa [#allocation4], 0  ;;  %s771_s15 = smov [#allocation2]  }
   0x3   :  { %s17_s16 = sshll.u32 %s771_s15, 4  ;;  %s18_s16 = int_to_ptr.vmem [resolvable:$true] %s17_s16 }
   0x4   :  { %s713_s17 = scalar_lea.vmem %s18_s16, 2048  ;;  %p718_p1 = scmp.lt.s32.totalorder %s18_s16, %s18_s16 }
   0x5   :  { %p714_p0 = scmp.ne.s32.totalorder %s18_s16, %s713_s17  ;;  %p719_p2 = scmp.lt.s32.totalorder %s713_s17, %s713_s17 }
   0x7   :  { %p720_p3 = por %p719_p2, %p718_p1 }
   0x9   :  { %p721_p4 = pnand %p720_p3, %p714_p0 }
   0xb   :  { %724 = shalt.err (!%p721_p4)
}
   0xc   :  { %s772_s18 = smov 64   ;;  %s773_s19 = smov 4  }
   0xd   :  { %23 = dma.hbm_to_vmem [thread:$0]  %s886_s0, 2048, %s18_s16, [#allocation3], %s772_s18, %s772_s18, %s773_s19  }
   0xe   :  { %s774_s22 = smov [#allocation5]  }
   0xf   :  { %s29_s23 = sshll.u32 %s774_s22, 4  ;;  %s30_s23 = int_to_ptr.vmem [resolvable:$true] %s29_s23 }
  0x10   :  { %s733_s24 = scalar_lea.vmem %s30_s23, 1024  ;;  %p738_p6 = scmp.lt.s32.totalorder %s30_s23, %s30_s23 }
  0x11   :  { %p734_p5 = scmp.ne.s32.totalorder %s30_s23, %s733_s24  ;;  %p739_p7 = scmp.lt.s32.totalorder %s733_s24, %s733_s24 }
  0x13   :  { %p740_p8 = por %p739_p7, %p738_p6 }
  0x15   :  { %p741_p9 = pnand %p740_p8, %p734_p5 }
  0x17   :  { %744 = shalt.err (!%p741_p9)
}
  0x18   :  { %35 = dma.hbm_to_vmem [thread:$0]  %s887_s1, 1024, %s30_s23, [#allocation6], %s772_s18, %s772_s18, %s773_s19  }
  0x19   :  { %765 = dma.done.wait [#allocation3], 2048  }
  0x1a   :  { %766 = vsyncadd [#allocation3], 4294965248 }
  0x1b   :  { %767 = dma.done.wait [#allocation6], 1024  }
  0x1c   :  { %768 = vsyncadd [#allocation6], 4294966272  ;;  %v681_v0 = vld [vmem:[#allocation5 + $0x38] sm:$0xff]   ;;  %v682_v1 = vld [vmem:[#allocation5 + $0x30] sm:$0xff]  }
  0x1d   :  { %610 = vmatprep.subr.bf16.mxu0 %v681_v0  ;;  %658 = vmatprep.subr.bf16.mxu1 %v681_v0  ;;  %v683_v2 = vld [vmem:[#allocation5 + $0x28] sm:$0xff]   ;;  %v684_v3 = vld [vmem:[#allocation5 + $0x20] sm:$0xff]   ;;  %v685_v6 = vld [vmem:[#allocation5 + $0x18] sm:$0xff]  }
  0x1e   :  { %611 = vmatpush3.bf16.msra.mxu0 %v681_v0  ;;  %666 = vmatpush3.bf16.msra.mxu1 %v681_v0  ;;  %v689_v4 = vld [vmem:[#allocation2] sm:$0xff]   ;;  %v686_v7 = vld [vmem:[#allocation5 + $0x10] sm:$0xff]   ;;  %v687_v8 = vld [vmem:[#allocation5 + $0x8] sm:$0xff]  }
  0x1f   :  { %612 = vmatprep.subr.bf16.mxu0 %v682_v1  ;;  %659 = vmatprep.subr.bf16.mxu1 %v682_v1  ;;  %v690_v5 = vld [vmem:[#allocation2 + $0x40] sm:$0xff]   ;;  %v691_v10 = vld [vmem:[#allocation2 + $0x8] sm:$0xff]   ;;  %v693_v12 = vld [vmem:[#allocation2 + $0x10] sm:$0xff]  }
  0x20   :  { %626 = vmatprep.mubr.bf16.mxu0 %v689_v4  ;;  %642 = vmatprep.mubr.bf16.mxu1 %v690_v5  ;;  %v688_v9 = vld [vmem:[#allocation5] sm:$0xff]   ;;  %v692_v11 = vld [vmem:[#allocation2 + $0x48] sm:$0xff]   ;;  %v694_v13 = vld [vmem:[#allocation2 + $0x50] sm:$0xff]  }
  0x21   :  { %v695_v14 = vld [vmem:[#allocation2 + $0x18] sm:$0xff]   ;;  %v697_v16 = vld [vmem:[#allocation2 + $0x20] sm:$0xff]   ;;  %v699_v18 = vld [vmem:[#allocation2 + $0x28] sm:$0xff]  }
  0x22   :  { %613 = vmatpush3.bf16.msra.mxu0 %v682_v1  ;;  %667 = vmatpush3.bf16.msra.mxu1 %v682_v1  ;;  %v696_v15 = vld [vmem:[#allocation2 + $0x58] sm:$0xff]   ;;  %v698_v17 = vld [vmem:[#allocation2 + $0x60] sm:$0xff]   ;;  %v700_v19 = vld [vmem:[#allocation2 + $0x68] sm:$0xff]  }
  0x23   :  { %614 = vmatprep.subr.bf16.mxu0 %v683_v2  ;;  %660 = vmatprep.subr.bf16.mxu1 %v683_v2  ;;  %v701_v20 = vld [vmem:[#allocation2 + $0x30] sm:$0xff]   ;;  %v703_v22 = vld [vmem:[#allocation2 + $0x38] sm:$0xff]   ;;  %v812_v24 = vld [vmem:[%s888_s2] ss:$0 sm:$0xff]  ;;  %s775_s2 = smov [#allocation7]  }
  0x24   :  { %v702_v21 = vld [vmem:[#allocation2 + $0x70] sm:$0xff]   ;;  %v704_v23 = vld [vmem:[#allocation2 + $0x78] sm:$0xff]   ;;  %v817_v26 = vld [vmem:[%s889_s3] ss:$0 sm:$0xff]  ;;  %s547_s3 = sshll.u32 %s775_s2, 4  ;;  %s548_s3 = int_to_ptr.vmem [resolvable:$true] %s547_s3 }
  0x25   :  { %s745_s29 = scalar_lea.vmem %s548_s3, 4096  ;;  %p750_p11 = scmp.lt.s32.totalorder %s548_s3, %s548_s3 }
  0x26   :  { %615 = vmatpush3.bf16.msra.mxu0 %v683_v2  ;;  %668 = vmatpush3.bf16.msra.mxu1 %v683_v2  ;;  %p746_p10 = scmp.ne.s32.totalorder %s548_s3, %s745_s29  ;;  %p751_p12 = scmp.lt.s32.totalorder %s745_s29, %s745_s29 }
  0x27   :  { %616 = vmatprep.subr.bf16.mxu0 %v684_v3  ;;  %661 = vmatprep.subr.bf16.mxu1 %v684_v3 }
  0x28   :  { %p752_p13 = por %p751_p12, %p750_p11 }
  0x2a   :  { %617 = vmatpush3.bf16.msra.mxu0 %v684_v3  ;;  %669 = vmatpush3.bf16.msra.mxu1 %v684_v3  ;;  %p753_p0 = pnand %p752_p13, %p746_p10 }
  0x2b   :  { %618 = vmatprep.subr.bf16.mxu0 %v685_v6  ;;  %662 = vmatprep.subr.bf16.mxu1 %v685_v6 }
  0x2e   :  { %619 = vmatpush3.bf16.msra.mxu0 %v685_v6  ;;  %670 = vmatpush3.bf16.msra.mxu1 %v685_v6 }
  0x2f   :  { %620 = vmatprep.subr.bf16.mxu0 %v686_v7  ;;  %663 = vmatprep.subr.bf16.mxu1 %v686_v7 }
  0x32   :  { %621 = vmatpush3.bf16.msra.mxu0 %v686_v7  ;;  %671 = vmatpush3.bf16.msra.mxu1 %v686_v7 }
  0x33   :  { %622 = vmatprep.subr.bf16.mxu0 %v687_v8  ;;  %664 = vmatprep.subr.bf16.mxu1 %v687_v8 }
  0x36   :  { %623 = vmatpush3.bf16.msra.mxu0 %v687_v8  ;;  %672 = vmatpush3.bf16.msra.mxu1 %v687_v8 }
  0x37   :  { %624 = vmatprep.subr.bf16.mxu0 %v688_v9  ;;  %665 = vmatprep.subr.bf16.mxu1 %v688_v9 }
  0x3a   :  { %625 = vmatpush3.bf16.msra.mxu0 %v688_v9  ;;  %673 = vmatpush3.bf16.msra.mxu1 %v688_v9 }
  0x3d   :  { %627 = vmatmul.mubr.bf16.vlgmr.msra.gmra.mxu0 %v691_v10  ;;  %643 = vmatmul.mubr.bf16.vlgmr.msra.gmra.mxu1 %v692_v11 }
  0x3e   :  { %630 = vmatprep.mubr.bf16.mxu0 %v693_v12  ;;  %646 = vmatprep.mubr.bf16.mxu1 %v694_v13 }
  0x45   :  { %631 = vmatmul.mubr.bf16.gmra.mxu0 %v695_v14  ;;  %647 = vmatmul.mubr.bf16.gmra.mxu1 %v696_v15 }
  0x46   :  { %634 = vmatprep.mubr.bf16.mxu0 %v697_v16  ;;  %650 = vmatprep.mubr.bf16.mxu1 %v698_v17 }
  0x4d   :  { %635 = vmatmul.mubr.bf16.gmra.mxu0 %v699_v18  ;;  %651 = vmatmul.mubr.bf16.gmra.mxu1 %v700_v19 }
  0x4e   :  { %638 = vmatprep.mubr.bf16.mxu0 %v701_v20  ;;  %654 = vmatprep.mubr.bf16.mxu1 %v702_v21 }
  0x55   :  { %639 = vmatmul.mubr.bf16.gmra.mxu0 %v703_v22  ;;  %655 = vmatmul.mubr.bf16.gmra.mxu1 %v704_v23 }
  0xfd   :  { %v628_v25 = vpop.f32.mrf.mxu0  ;;  %v644_v27 = vpop.f32.mrf.mxu1 }
  0xfe   :  { %v409_v28 = vmul.f32 %v628_v25, %v812_v24  ;;  %v425_v29 = vmul.f32 %v644_v27, %v812_v24 }
  0xff   :  { %v273_v30 = vpop.f32.mrf.mxu0  ;;  %v337_v31 = vpop.f32.mrf.mxu1 }
 0x100   :  { %v448_v32 = vadd.f32 %v817_v26, %v409_v28  ;;  %v464_v33 = vadd.f32 %v817_v26, %v425_v29  ;;  %v407_v34 = vmul.f32 %v812_v24, %v273_v30  ;;  %v423_v35 = vmul.f32 %v812_v24, %v337_v31 }
 0x101   :  { %v629_v36 = vpop.f32.mrf.mxu0  ;;  %v645_v37 = vpop.f32.mrf.mxu1 }
 0x102   :  { %v480_v38 = vmax.f32 %v448_v32, 0.0  ;;  %v496_v39 = vmax.f32 %v464_v33, 0.0  ;;  %v446_v40 = vadd.f32 %v817_v26, %v407_v34  ;;  %v462_v41 = vadd.f32 %v817_v26, %v423_v35 }
 0x103   :  { %v410_v42 = vmul.f32 %v629_v36, %v812_v24  ;;  %v426_v43 = vmul.f32 %v645_v37, %v812_v24  ;;  %v276_v44 = vpop.f32.mrf.mxu0  ;;  %v340_v45 = vpop.f32.mrf.mxu1 }
 0x104   :  { %512 = vst [vmem:[#allocation7 + $0x10] sm:$0xff] %v480_v38  ;;  %528 = vst [vmem:[#allocation7 + $0x90] sm:$0xff] %v496_v39  ;;  %v478_v46 = vmax.f32 %v446_v40, 0.0  ;;  %v494_v47 = vmax.f32 %v462_v41, 0.0  ;;  %v408_v48 = vmul.f32 %v812_v24, %v276_v44  ;;  %v424_v49 = vmul.f32 %v812_v24, %v340_v45 }
 0x105   :  { %v449_v50 = vadd.f32 %v817_v26, %v410_v42  ;;  %v465_v51 = vadd.f32 %v817_v26, %v426_v43  ;;  %v632_v52 = vpop.f32.mrf.mxu0  ;;  %v648_v53 = vpop.f32.mrf.mxu1 }
 0x106   :  { %510 = vst [vmem:[#allocation7] sm:$0xff] %v478_v46  ;;  %526 = vst [vmem:[#allocation7 + $0x80] sm:$0xff] %v494_v47  ;;  %v447_v54 = vadd.f32 %v817_v26, %v408_v48  ;;  %v463_v55 = vadd.f32 %v817_v26, %v424_v49  ;;  %v413_v56 = vmul.f32 %v632_v52, %v812_v24 }
 0x107   :  { %v429_v57 = vmul.f32 %v648_v53, %v812_v24  ;;  %v481_v58 = vmax.f32 %v449_v50, 0.0  ;;  %v497_v59 = vmax.f32 %v465_v51, 0.0  ;;  %v289_v60 = vpop.f32.mrf.mxu0  ;;  %v353_v61 = vpop.f32.mrf.mxu1 }
 0x108   :  { %v479_v62 = vmax.f32 %v447_v54, 0.0  ;;  %v495_v63 = vmax.f32 %v463_v55, 0.0  ;;  %v452_v0 = vadd.f32 %v817_v26, %v413_v56  ;;  %v411_v2 = vmul.f32 %v812_v24, %v289_v60 }
 0x109   :  { %v468_v1 = vadd.f32 %v817_v26, %v429_v57  ;;  %513 = vst [vmem:[#allocation7 + $0x18] sm:$0xff] %v481_v58  ;;  %529 = vst [vmem:[#allocation7 + $0x98] sm:$0xff] %v497_v59  ;;  %v427_v3 = vmul.f32 %v812_v24, %v353_v61  ;;  %v633_v4 = vpop.f32.mrf.mxu0  ;;  %v649_v5 = vpop.f32.mrf.mxu1 }
 0x10a   :  { %511 = vst [vmem:[#allocation7 + $0x8] sm:$0xff] %v479_v62  ;;  %527 = vst [vmem:[#allocation7 + $0x88] sm:$0xff] %v495_v63  ;;  %v484_v6 = vmax.f32 %v452_v0, 0.0  ;;  %v414_v8 = vmul.f32 %v633_v4, %v812_v24  ;;  %v430_v9 = vmul.f32 %v649_v5, %v812_v24  ;;  %v450_v10 = vadd.f32 %v817_v26, %v411_v2 }
 0x10b   :  { %v500_v7 = vmax.f32 %v468_v1, 0.0  ;;  %v466_v11 = vadd.f32 %v817_v26, %v427_v3  ;;  %v292_v12 = vpop.f32.mrf.mxu0  ;;  %v356_v13 = vpop.f32.mrf.mxu1 }
 0x10c   :  { %516 = vst [vmem:[#allocation7 + $0x30] sm:$0xff] %v484_v6  ;;  %v453_v14 = vadd.f32 %v817_v26, %v414_v8  ;;  %v469_v15 = vadd.f32 %v817_v26, %v430_v9  ;;  %v412_v16 = vmul.f32 %v812_v24, %v292_v12  ;;  %v428_v17 = vmul.f32 %v812_v24, %v356_v13 }
 0x10d   :  { %532 = vst [vmem:[#allocation7 + $0xb0] sm:$0xff] %v500_v7  ;;  %v482_v18 = vmax.f32 %v450_v10, 0.0  ;;  %v498_v19 = vmax.f32 %v466_v11, 0.0  ;;  %v636_v20 = vpop.f32.mrf.mxu0  ;;  %v652_v21 = vpop.f32.mrf.mxu1 }
 0x10e   :  { %v485_v22 = vmax.f32 %v453_v14, 0.0  ;;  %v501_v23 = vmax.f32 %v469_v15, 0.0  ;;  %v451_v25 = vadd.f32 %v817_v26, %v412_v16  ;;  %v467_v27 = vadd.f32 %v817_v26, %v428_v17 }
 0x10f   :  { %514 = vst [vmem:[#allocation7 + $0x20] sm:$0xff] %v482_v18  ;;  %530 = vst [vmem:[#allocation7 + $0xa0] sm:$0xff] %v498_v19  ;;  %v417_v28 = vmul.f32 %v636_v20, %v812_v24  ;;  %v433_v29 = vmul.f32 %v652_v21, %v812_v24  ;;  %v305_v30 = vpop.f32.mrf.mxu0  ;;  %v369_v31 = vpop.f32.mrf.mxu1 }
 0x110   :  { %517 = vst [vmem:[#allocation7 + $0x38] sm:$0xff] %v485_v22  ;;  %533 = vst [vmem:[#allocation7 + $0xb8] sm:$0xff] %v501_v23  ;;  %v483_v32 = vmax.f32 %v451_v25, 0.0  ;;  %v499_v33 = vmax.f32 %v467_v27, 0.0  ;;  %v415_v34 = vmul.f32 %v812_v24, %v305_v30  ;;  %v431_v35 = vmul.f32 %v812_v24, %v369_v31 }
 0x111   :  { %v456_v36 = vadd.f32 %v817_v26, %v417_v28  ;;  %v472_v37 = vadd.f32 %v817_v26, %v433_v29  ;;  %v637_v38 = vpop.f32.mrf.mxu0  ;;  %v653_v39 = vpop.f32.mrf.mxu1 }
 0x112   :  { %515 = vst [vmem:[#allocation7 + $0x28] sm:$0xff] %v483_v32  ;;  %531 = vst [vmem:[#allocation7 + $0xa8] sm:$0xff] %v499_v33  ;;  %v454_v40 = vadd.f32 %v817_v26, %v415_v34  ;;  %v470_v41 = vadd.f32 %v817_v26, %v431_v35  ;;  %v418_v42 = vmul.f32 %v637_v38, %v812_v24 }
 0x113   :  { %v434_v43 = vmul.f32 %v653_v39, %v812_v24  ;;  %v488_v44 = vmax.f32 %v456_v36, 0.0  ;;  %v504_v45 = vmax.f32 %v472_v37, 0.0  ;;  %v308_v46 = vpop.f32.mrf.mxu0  ;;  %v372_v47 = vpop.f32.mrf.mxu1 }
 0x114   :  { %v486_v48 = vmax.f32 %v454_v40, 0.0  ;;  %v502_v49 = vmax.f32 %v470_v41, 0.0  ;;  %v457_v50 = vadd.f32 %v817_v26, %v418_v42  ;;  %v416_v52 = vmul.f32 %v812_v24, %v308_v46 }
 0x115   :  { %v473_v51 = vadd.f32 %v817_v26, %v434_v43  ;;  %520 = vst [vmem:[#allocation7 + $0x50] sm:$0xff] %v488_v44  ;;  %536 = vst [vmem:[#allocation7 + $0xd0] sm:$0xff] %v504_v45  ;;  %v432_v53 = vmul.f32 %v812_v24, %v372_v47  ;;  %v640_v54 = vpop.f32.mrf.mxu0  ;;  %v656_v55 = vpop.f32.mrf.mxu1 }
 0x116   :  { %518 = vst [vmem:[#allocation7 + $0x40] sm:$0xff] %v486_v48  ;;  %534 = vst [vmem:[#allocation7 + $0xc0] sm:$0xff] %v502_v49  ;;  %v489_v56 = vmax.f32 %v457_v50, 0.0  ;;  %v421_v58 = vmul.f32 %v640_v54, %v812_v24  ;;  %v437_v59 = vmul.f32 %v656_v55, %v812_v24  ;;  %v455_v60 = vadd.f32 %v817_v26, %v416_v52 }
 0x117   :  { %v505_v57 = vmax.f32 %v473_v51, 0.0  ;;  %v471_v61 = vadd.f32 %v817_v26, %v432_v53  ;;  %v321_v62 = vpop.f32.mrf.mxu0  ;;  %v385_v63 = vpop.f32.mrf.mxu1 }
 0x118   :  { %521 = vst [vmem:[#allocation7 + $0x58] sm:$0xff] %v489_v56  ;;  %v460_v0 = vadd.f32 %v817_v26, %v421_v58  ;;  %v476_v1 = vadd.f32 %v817_v26, %v437_v59  ;;  %v419_v2 = vmul.f32 %v812_v24, %v321_v62  ;;  %v435_v3 = vmul.f32 %v812_v24, %v385_v63 }
 0x119   :  { %537 = vst [vmem:[#allocation7 + $0xd8] sm:$0xff] %v505_v57  ;;  %v487_v4 = vmax.f32 %v455_v60, 0.0  ;;  %v503_v5 = vmax.f32 %v471_v61, 0.0  ;;  %v641_v6 = vpop.f32.mrf.mxu0  ;;  %v657_v7 = vpop.f32.mrf.mxu1 }
 0x11a   :  { %v492_v8 = vmax.f32 %v460_v0, 0.0  ;;  %v508_v9 = vmax.f32 %v476_v1, 0.0  ;;  %v458_v10 = vadd.f32 %v817_v26, %v419_v2  ;;  %v474_v11 = vadd.f32 %v817_v26, %v435_v3 }
 0x11b   :  { %519 = vst [vmem:[#allocation7 + $0x48] sm:$0xff] %v487_v4  ;;  %535 = vst [vmem:[#allocation7 + $0xc8] sm:$0xff] %v503_v5  ;;  %v422_v12 = vmul.f32 %v641_v6, %v812_v24  ;;  %v438_v13 = vmul.f32 %v657_v7, %v812_v24  ;;  %v324_v14 = vpop.f32.mrf.mxu0  ;;  %v388_v15 = vpop.f32.mrf.mxu1 }
 0x11c   :  { %524 = vst [vmem:[#allocation7 + $0x70] sm:$0xff] %v492_v8  ;;  %540 = vst [vmem:[#allocation7 + $0xf0] sm:$0xff] %v508_v9  ;;  %v490_v16 = vmax.f32 %v458_v10, 0.0  ;;  %v506_v17 = vmax.f32 %v474_v11, 0.0  ;;  %v420_v18 = vmul.f32 %v812_v24, %v324_v14  ;;  %v436_v19 = vmul.f32 %v812_v24, %v388_v15 }
 0x11d   :  { %v461_v20 = vadd.f32 %v817_v26, %v422_v12  ;;  %v477_v21 = vadd.f32 %v817_v26, %v438_v13 }
 0x11e   :  { %522 = vst [vmem:[#allocation7 + $0x60] sm:$0xff] %v490_v16  ;;  %538 = vst [vmem:[#allocation7 + $0xe0] sm:$0xff] %v506_v17  ;;  %v459_v22 = vadd.f32 %v817_v26, %v420_v18  ;;  %v475_v23 = vadd.f32 %v817_v26, %v436_v19 }
 0x11f   :  { %v493_v25 = vmax.f32 %v461_v20, 0.0  ;;  %v509_v27 = vmax.f32 %v477_v21, 0.0 }
 0x120   :  { %v491_v28 = vmax.f32 %v459_v22, 0.0  ;;  %v507_v29 = vmax.f32 %v475_v23, 0.0 }
 0x121   :  { %525 = vst [vmem:[#allocation7 + $0x78] sm:$0xff] %v493_v25  ;;  %541 = vst [vmem:[#allocation7 + $0xf8] sm:$0xff] %v509_v27 }
 0x122   :  { %523 = vst [vmem:[#allocation7 + $0x68] sm:$0xff] %v491_v28  ;;  %539 = vst [vmem:[#allocation7 + $0xe8] sm:$0xff] %v507_v29 }
 0x123   :  { %756 = shalt.err (!%p753_p0)
}
 0x124   :  { %s776_s30 = smov 128   ;;  %s777_s5 = smov 8  }
 0x125   :  { %553 = dma.vmem_to_hbm [thread:$0]  %s548_s3, 4096, %s890_s4, [#allocation4], %s776_s30, %s776_s30, %s777_s5  }
 0x126   :  { %769 = dma.done.wait [#allocation4], 4096  }
 0x127   :  { %770 = vsyncadd [#allocation4], 4294963200 }
 0x128   :  { %557 = vsyncpa [#allocation3], 1 }
 0x129   :  { %558 = vsyncpa [#allocation6], 1 }
 0x12a   :  { %559 = vsyncpa [#allocation4], 1 }

</bundles_post_ra>
